<compile_context>
chip_gen: v6e
topology: v6e:2x2x1
jax: 0.10.0
libtpu: 0.0.40
codegen_flags: <defaults>
</compile_context>

<pallas_src>
import math
import functools

import jax
import jax.numpy as jnp
from jax.experimental import pallas as pl
from jax.experimental.pallas import tpu as pltpu


def _round_up(x, m):
    return ((x + m - 1) // m) * m


# ---------------- tiling plan ----------------

def plan_gat_tiles(num_nodes, *, block_rows=256, block_cols=1024):
    """Pick (tm, tn, n_pad) for the attention stage.

    Sweep guidance: block_rows 256-512 on v5e/v6e (128 MiB VMEM); 128-256 on
    v7x (64 MiB VMEM; we also force >=2 row tiles for its 2 TensorCores).
    block_cols 512-2048 -- the column axis is the online-softmax reduction.
    """
    lane = 128  # lane tiling of the mask / h tiles
    sub = 32    # int8 sublane packing of the adjacency mask
    tn = min(_round_up(max(block_cols, lane), lane), _round_up(num_nodes, lane))
    n_pad = _round_up(num_nodes, tn)
    cap = min(_round_up(max(block_rows, sub), sub), n_pad)
    if n_pad >= 2 * sub:
        cap = min(cap, n_pad // 2)  # >= 2 row tiles: keep both v7x TCs busy
    tm = (cap // sub) * sub
    while n_pad % tm:
        tm -= sub
    return tm, tn, n_pad


def _vmem_limit_bytes(tm, tn, in_f, out_f):
    """Right-size the scoped-VMEM limit from the tile working set (v7x-safe)."""
    # Stage 1: double-buffered x tile, W, a rows, h/hi/hj output tiles.
    s1 = 2 * (tm * in_f * 4 + in_f * out_f * 4 + 2 * out_f * 4
              + tm * out_f * 2 + 2 * tm * 4)
    # Stage 2: double-buffered hi/hj/mask/h/out tiles + persistent scratch.
    s2 = (2 * (tm * 4 + tn * 4 + tm * tn * 1 + tn * out_f * 2 + tm * out_f * 4)
          + 2 * tm * 4 + tm * out_f * 4)
    need = 4 * max(s1, s2)            # generous headroom for Mosaic internals
    floor = 32 * 1024 * 1024          # <= 50% of v7x's 64 MiB per-TC VMEM
    cap = 100 * 1024 * 1024
    return int(min(cap, max(floor, need)))


# ---------------- once-per-graph adjacency preprocessing ----------------

def prepare_adjacency_mask(adj, n_pad):
    """Build the padded int8 {0,1} neighbor mask ONCE per graph.

    Hoisting this out of the per-call path removes an N^2 f32-read + int8-write
    HBM pass per forward; the kernel then streams 1 byte/entry (4x less than
    streaming the f32 adjacency)."""
    n = adj.shape[0]
    mask = (adj > 0).astype(jnp.int8)
    if n_pad != n:
        mask = jnp.pad(mask, ((0, n_pad - n), (0, n_pad - n)))
    return mask


# ---------------- stage 1: h = x @ W fused with attention projections ----------------

def _proj_kernel(x_ref, w_ref, a1t_ref, a2t_ref, h_ref, hi_ref, hj_ref):
    # h_tile = x_tile @ W   (MXU, f32 accumulate)
    h = jnp.dot(x_ref[...], w_ref[...], preferred_element_type=jnp.float32)
    # Hoisted projections: h_i = h @ a[:F],  h_j = h @ a[F:]  (once per row).
    hi_ref[...] = jnp.sum(h * a1t_ref[...], axis=-1, keepdims=True)
    hj_ref[...] = jnp.sum(h * a2t_ref[...], axis=-1, keepdims=True)
    # Store h as bf16: halves HBM/VMEM bytes; MXU-native operand on all gens.
    h_ref[...] = h.astype(h_ref.dtype)


# ---------------- stage 2: column-tiled masked attention, online softmax ----------------

def _gat_attn_kernel(hi_ref, hj_ref, mask_ref, h_ref, o_ref,
                     m_sc, l_sc, acc_sc, *, alpha, exp_dtype):
    j = pl.program_id(1)

    @pl.when(j == 0)
    def _():
        # Finite very-negative init (not -inf): padded / fully-masked rows then
        # produce a finite uniform-softmax result that is sliced off, matching
        # torch.masked_fill(..., -1e9) semantics.
        m_sc[...] = jnp.full_like(m_sc, -1e30)
        l_sc[...] = jnp.zeros_like(l_sc)
        acc_sc[...] = jnp.zeros_like(acc_sc)

    # e = leaky_relu(h_i + h_j.T) for this (row, col) tile; h_j is lane-major.
    e = hi_ref[...] + hj_ref[...]                       # (tm, tn) f32
    e = jnp.where(e > 0, e, alpha * e)                  # LeakyReLU(alpha)
    # masked_fill(e, adj <= 0, -1e9); adjacency streamed as int8 {0,1} mask.
    e = jnp.where(mask_ref[...] > 0, e, jnp.float32(-1e9))

    # Online (flash-style) softmax update: running max / sum / f32 accumulator.
    m_prev = m_sc[...]
    m_new = jnp.maximum(m_prev, jnp.max(e, axis=-1, keepdims=True))
    corr = jnp.exp(m_prev - m_new)
    # exp_dtype=bf16 roughly doubles EUP throughput on v6e/v7x; keep f32 on v5e.
    p = jnp.exp((e - m_new).astype(exp_dtype)).astype(jnp.float32)
    l_sc[...] = corr * l_sc[...] + jnp.sum(p, axis=-1, keepdims=True)
    acc_sc[...] = corr * acc_sc[...] + jnp.dot(
        p.astype(h_ref.dtype), h_ref[...], preferred_element_type=jnp.float32)
    m_sc[...] = m_new

    # TODO(synk): nn.Dropout on the attention matrix omitted (eval semantics).

    @pl.when(j == pl.num_programs(1) - 1)
    def _():
        inv_l = pl.reciprocal(l_sc[...], approx=False)   # exact normalization
        o_ref[...] = (acc_sc[...] * inv_l).astype(o_ref.dtype)


# ---------------- wrapper ----------------

def graph_attention_layer(x, adj, W, a, *, alpha=0.2, block_rows=256,
                          block_cols=1024, mask=None, vmem_limit_bytes=None,
                          exp_dtype=jnp.float32):
    """GAT layer forward.

    x: (N, in_f) f32, adj: (N, N) (or None if `mask` given), W: (in_f, out_f),
    a: (2*out_f, 1).  `mask` is an optional pre-built padded int8 mask from
    prepare_adjacency_mask (hoist it out of the per-call path in production).
    """
    N, in_f = x.shape
    out_f = W.shape[1]

    tm, tn, n_pad = plan_gat_tiles(N, block_rows=block_rows,
                                   block_cols=block_cols)
    if vmem_limit_bytes is None:
        vmem_limit_bytes = _vmem_limit_bytes(tm, tn, in_f, out_f)

    # Pad rows with zeros: padded columns are masked out for real rows; padded
    # rows produce finite (uniform-softmax) junk that is sliced away.
    xp = x.astype(jnp.float32)
    if n_pad != N:
        xp = jnp.pad(xp, ((0, n_pad - N), (0, 0)))

    if mask is None:
        # Per-call fallback: an N^2 HBM pass -- prefer hoisting via
        # prepare_adjacency_mask and reusing across heads / layers / calls.
        mask = prepare_adjacency_mask(adj, n_pad)
    assert mask.shape == (n_pad, n_pad) and mask.dtype == jnp.int8, (
        f"mask must be int8 ({n_pad}, {n_pad}); got {mask.dtype} {mask.shape}")

    a1t = a[:out_f, :].reshape(1, out_f).astype(jnp.float32)
    a2t = a[out_f:, :].reshape(1, out_f).astype(jnp.float32)
    Wf = W.astype(jnp.float32)

    grid_rows = n_pad // tm
    grid_cols = n_pad // tn

    # ---- stage 1: projections (row-tiled) ----
    h, hi, hj = pl.pallas_call(
        _proj_kernel,
        out_shape=(
            jax.ShapeDtypeStruct((n_pad, out_f), jnp.bfloat16),  # h (bf16)
            jax.ShapeDtypeStruct((n_pad, 1), jnp.float32),       # h_i
            jax.ShapeDtypeStruct((n_pad, 1), jnp.float32),       # h_j
        ),
        grid=(grid_rows,),
        in_specs=[
            pl.BlockSpec((tm, in_f), lambda i: (i, 0)),       # x row tile
            pl.BlockSpec((in_f, out_f), lambda i: (0, 0)),    # W (invariant)
            pl.BlockSpec((1, out_f), lambda i: (0, 0)),       # a[:F].T
            pl.BlockSpec((1, out_f), lambda i: (0, 0)),       # a[F:].T
        ],
        out_specs=(
            pl.BlockSpec((tm, out_f), lambda i: (i, 0)),
            pl.BlockSpec((tm, 1), lambda i: (i, 0)),
            pl.BlockSpec((tm, 1), lambda i: (i, 0)),
        ),
        compiler_params=pltpu.CompilerParams(
            dimension_semantics=("parallel",),
            vmem_limit_bytes=vmem_limit_bytes),
    )(xp, Wf, a1t, a2t)

    # Grid-invariant h_j laid out lane-major (1, N): O(N) relayout vs the O(N^2)
    # streams below (kept wrapper-side for robustness; zero-cost micro-win).
    hj_row = hj.reshape(1, n_pad)

    # ---- stage 2: (row x column)-tiled masked attention with online softmax ----
    kernel = functools.partial(_gat_attn_kernel, alpha=float(alpha),
                               exp_dtype=exp_dtype)
    out = pl.pallas_call(
        kernel,
        out_shape=jax.ShapeDtypeStruct((n_pad, out_f), x.dtype),
        grid=(grid_rows, grid_cols),
        in_specs=[
            pl.BlockSpec((tm, 1), lambda i, j: (i, 0)),       # h_i row tile
            pl.BlockSpec((1, tn), lambda i, j: (0, j)),       # h_j col tile (lane-major)
            pl.BlockSpec((tm, tn), lambda i, j: (i, j)),      # int8 adj-mask tile
            pl.BlockSpec((tn, out_f), lambda i, j: (j, 0)),   # h col tile (bf16)
        ],
        out_specs=pl.BlockSpec((tm, out_f), lambda i, j: (i, 0)),
        scratch_shapes=[
            pltpu.VMEM((tm, 1), jnp.float32),       # running max
            pltpu.VMEM((tm, 1), jnp.float32),       # running sum
            pltpu.VMEM((tm, out_f), jnp.float32),   # f32 accumulator
        ],
        compiler_params=pltpu.CompilerParams(
            dimension_semantics=("parallel", "arbitrary"),
            vmem_limit_bytes=vmem_limit_bytes),
    )(hi, hj_row, mask, h)

    return out[:N]


# ---------------- deterministic parameter init ----------------

def xavier_uniform(key, shape, gain):
    fan_in, fan_out = shape[0], shape[1]
    bound = gain * math.sqrt(6.0 / (fan_in + fan_out))
    return jax.random.uniform(key, shape, jnp.float32, -bound, bound)


# ---------------- reference (plain JAX) ----------------

def reference(x, adj, W, a, alpha):
    F = W.shape[1]
    h = x @ W
    h_i = h @ a[:F, :]
    h_j = h @ a[F:, :]
    e = h_i + h_j.T
    e = jnp.where(e > 0, e, alpha * e)
    e = jnp.where(adj <= 0, jnp.float32(-1e9), e)
    attn = jax.nn.softmax(e, axis=-1)
    return attn @ h


if __name__ == "__main__":
    N, in_feature, out_feature = 256, 64, 32
    alpha = 0.2

    key = jax.random.PRNGKey(0)
    k_x, k_adj, k_W, k_a = jax.random.split(key, 4)

    x = jax.random.normal(k_x, (N, in_feature), jnp.float32)

    # Random sparse adjacency with self-loops (so no real row is fully masked).
    adj = (jax.random.uniform(k_adj, (N, N)) < 0.15).astype(jnp.float32)
    adj = jnp.maximum(adj, jnp.eye(N, dtype=jnp.float32))

    W = xavier_uniform(k_W, (in_feature, out_feature), gain=1.414)
    a = xavier_uniform(k_a, (2 * out_feature, 1), gain=1.414)

    # Hoisted, once-per-graph mask preprocessing (reuse across heads / layers).
    tm, tn, n_pad = plan_gat_tiles(N)
    mask = prepare_adjacency_mask(adj, n_pad)

    out = graph_attention_layer(x, None, W, a, alpha=alpha, mask=mask)
    out = jax.block_until_ready(out)

    ref = reference(x, adj, W, a, alpha)
    assert out.shape == (N, out_feature)
    max_err = float(jnp.max(jnp.abs(out - ref)))
    # bf16 storage of h (with f32 accumulation) is the dominant numeric delta
    # vs the f32 reference; tolerance documented accordingly.
    assert jnp.allclose(out, ref, rtol=2e-2, atol=2e-2), max_err

    print("KERNEL_OK")
</pallas_src>

<mosaic_0001>
module attributes {stable_mosaic.version = 11 : i64} {
  func.func @_proj_kernel(%arg0: i32, %arg1: memref<128x64xf32, #tpu.memory_space<vmem>>, %arg2: memref<64x32xf32, #tpu.memory_space<vmem>>, %arg3: memref<1x32xf32, #tpu.memory_space<vmem>>, %arg4: memref<1x32xf32, #tpu.memory_space<vmem>>, %arg5: memref<128x32xbf16, #tpu.memory_space<vmem>>, %arg6: memref<128x1xf32, #tpu.memory_space<vmem>>, %arg7: memref<128x1xf32, #tpu.memory_space<vmem>>) attributes {dimension_semantics = [#tpu.dimension_semantics<parallel>], iteration_bounds = array<i64: 2>, scalar_prefetch = 0 : i64, scratch_operands = 0 : i64, tpu.core_type = #tpu.core_type<tc>, window_params = [{transform_indices = @transform_0, window_bounds = array<i64: 128, 64>}, {pipeline_mode = #tpu.pipeline_mode<synchronous>, transform_indices = @transform_1, window_bounds = array<i64: 64, 32>}, {pipeline_mode = #tpu.pipeline_mode<synchronous>, transform_indices = @transform_2, window_bounds = array<i64: 1, 32>}, {pipeline_mode = #tpu.pipeline_mode<synchronous>, transform_indices = @transform_3, window_bounds = array<i64: 1, 32>}, {transform_indices = @transform_4, window_bounds = array<i64: 128, 32>}, {transform_indices = @transform_5, window_bounds = array<i64: 128, 1>}, {transform_indices = @transform_6, window_bounds = array<i64: 128, 1>}]} {
    %c0 = arith.constant 0 : index
    %c0_0 = arith.constant 0 : index
    %0 = vector.load %arg1[%c0, %c0_0] : memref<128x64xf32, #tpu.memory_space<vmem>>, vector<128x64xf32>
    %c0_1 = arith.constant 0 : index
    %c0_2 = arith.constant 0 : index
    %1 = vector.load %arg2[%c0_1, %c0_2] : memref<64x32xf32, #tpu.memory_space<vmem>>, vector<64x32xf32>
    %cst = arith.constant dense<0.000000e+00> : vector<128x32xf32>
    %2 = tpu.matmul %0, %1, %cst {dimension_numbers = #tpu.dot_dimension_numbers<[1], [0], [0], [1], [0, 0, 1, 1], [], []>} : vector<128x64xf32>, vector<64x32xf32>, vector<128x32xf32> -> vector<128x32xf32>
    %c0_3 = arith.constant 0 : index
    %c0_4 = arith.constant 0 : index
    %3 = vector.load %arg3[%c0_3, %c0_4] : memref<1x32xf32, #tpu.memory_space<vmem>>, vector<1x32xf32>
    %4 = vector.broadcast %3 : vector<1x32xf32> to vector<128x32xf32>
    %5 = arith.mulf %2, %4 : vector<128x32xf32>
    %cst_5 = arith.constant dense<0.000000e+00> : vector<128xf32>
    %6 = vector.multi_reduction <add>, %5, %cst_5 [1] : vector<128x32xf32> to vector<128xf32>
    %7 = vector.shape_cast %6 : vector<128xf32> to vector<128x1xf32>
    %c0_6 = arith.constant 0 : index
    %c0_7 = arith.constant 0 : index
    %8 = vector.load %arg6[%c0_6, %c0_7] : memref<128x1xf32, #tpu.memory_space<vmem>>, vector<128x1xf32>
    tpu.vector_store %arg6[%c0_6, %c0_7], %7 {strides = array<i32>} : memref<128x1xf32, #tpu.memory_space<vmem>>, vector<128x1xf32>,
    %c0_8 = arith.constant 0 : index
    %c0_9 = arith.constant 0 : index
    %9 = vector.load %arg4[%c0_8, %c0_9] : memref<1x32xf32, #tpu.memory_space<vmem>>, vector<1x32xf32>
    %10 = vector.broadcast %9 : vector<1x32xf32> to vector<128x32xf32>
    %11 = arith.mulf %2, %10 : vector<128x32xf32>
    %cst_10 = arith.constant dense<0.000000e+00> : vector<128xf32>
    %12 = vector.multi_reduction <add>, %11, %cst_10 [1] : vector<128x32xf32> to vector<128xf32>
    %13 = vector.shape_cast %12 : vector<128xf32> to vector<128x1xf32>
    %c0_11 = arith.constant 0 : index
    %c0_12 = arith.constant 0 : index
    %14 = vector.load %arg7[%c0_11, %c0_12] : memref<128x1xf32, #tpu.memory_space<vmem>>, vector<128x1xf32>
    tpu.vector_store %arg7[%c0_11, %c0_12], %13 {strides = array<i32>} : memref<128x1xf32, #tpu.memory_space<vmem>>, vector<128x1xf32>,
    %15 = arith.truncf %2 : vector<128x32xf32> to vector<128x32xbf16>
    %c0_13 = arith.constant 0 : index
    %c0_14 = arith.constant 0 : index
    %16 = vector.load %arg5[%c0_13, %c0_14] : memref<128x32xbf16, #tpu.memory_space<vmem>>, vector<128x32xbf16>
    tpu.vector_store %arg5[%c0_13, %c0_14], %15 {strides = array<i32>} : memref<128x32xbf16, #tpu.memory_space<vmem>>, vector<128x32xbf16>,
    return
  }
  func.func @transform_0(%arg0: i32) -> (i32, i32) {
    %c0_i32 = arith.constant 0 : i32
    %c0_i32_0 = arith.constant 0 : i32
    return %arg0, %c0_i32 : i32, i32
  }
  func.func @transform_1(%arg0: i32) -> (i32, i32) {
    %c0_i32 = arith.constant 0 : i32
    %c0_i32_0 = arith.constant 0 : i32
    %c0_i32_1 = arith.constant 0 : i32
    return %c0_i32, %c0_i32_0 : i32, i32
  }
  func.func @transform_2(%arg0: i32) -> (i32, i32) {
    %c0_i32 = arith.constant 0 : i32
    %c0_i32_0 = arith.constant 0 : i32
    %c0_i32_1 = arith.constant 0 : i32
    return %c0_i32, %c0_i32_0 : i32, i32
  }
  func.func @transform_3(%arg0: i32) -> (i32, i32) {
    %c0_i32 = arith.constant 0 : i32
    %c0_i32_0 = arith.constant 0 : i32
    %c0_i32_1 = arith.constant 0 : i32
    return %c0_i32, %c0_i32_0 : i32, i32
  }
  func.func @transform_4(%arg0: i32) -> (i32, i32) {
    %c0_i32 = arith.constant 0 : i32
    %c0_i32_0 = arith.constant 0 : i32
    return %arg0, %c0_i32 : i32, i32
  }
  func.func @transform_5(%arg0: i32) -> (i32, i32) {
    %c0_i32 = arith.constant 0 : i32
    %c0_i32_0 = arith.constant 0 : i32
    return %arg0, %c0_i32 : i32, i32
  }
  func.func @transform_6(%arg0: i32) -> (i32, i32) {
    %c0_i32 = arith.constant 0 : i32
    %c0_i32_0 = arith.constant 0 : i32
    return %arg0, %c0_i32 : i32, i32
  }
}

</mosaic_0001>

<bundles_post_ra>
// kernel: tpu_custom_call.1
= control target key start
LH: loop header
LB: loop body
LE: loop exit
PB: predicated region body
PF: predicated region fallthrough
CT: control target
= control target key end

     0   :  { %s1077_s21 = smov 0   ;;  %s1403_s0 = inlined_call_operand.vmem [shape: f32[256,64], index: 0, kind: input, shape index: {}]   ;;  %s1404_s1 = inlined_call_operand.vmem [shape: f32[64,32], index: 1, kind: input, shape index: {}]   ;;  %s1405_s2 = inlined_call_operand.vmem [shape: f32[1,32], index: 2, kind: input, shape index: {}]   ;;  %s1406_s3 = inlined_call_operand.vmem [shape: f32[1,32], index: 3, kind: input, shape index: {}]   ;;  %s1407_s4 = inlined_call_operand.vmem [shape: bf16[256,32], index: 4, kind: output, shape index: {0}]   ;;  %s1408_s5 = inlined_call_operand.vmem [shape: f32[256,1], index: 5, kind: output, shape index: {1}]   ;;  %s1409_s6 = inlined_call_operand.vmem [shape: f32[256,1], index: 6, kind: output, shape index: {2}]  }
   0x1 LB: > { %s881_s22 = sadd.s32 4294967295, %s1040_s21   ;;  %p885_p0 = scmp.ge.s32.totalorder %s1040_s21, 1  ;;  %s1040_s21 = sphi %s1077_s21, %s17_s21  }
   0x2   : > { %p218_p1 = scmp.lt.s32.totalorder %s1040_s21, 3 }
   0x4   : > { %p219_p2 = pnand %p885_p0, %p218_p1 }
   0x5   : > { %s886_s27 = sshll.u32 (!%p219_p2), %s881_s22, 4 }
   0x6   : > { %222 = sbr.rel (%p219_p2) target bundleno = 424 (0x1a8), region = 36  ;;  %p259_p3 = scmp.lt.s32.totalorder (!%p219_p2), %s886_s27, 31 }
   0xb   : > { %v305_v0 = vld [vmem:[%s1404_s1 + $0x38] sm:$0xff]  ;;  %v304_v1 = vld [vmem:[%s1404_s1 + $0x30] sm:$0xff]  ;;  %v303_v2 = vld [vmem:[%s1404_s1 + $0x28] sm:$0xff]  ;;  %s1411_s27 = smov (!%p259_p3, %s886_s27), 31  ;;  %vm306_vm0 = vcmask 523264   ;;  %vm740_vm1 = vcmask 257024  }
   0xc   : > { %970 = vmatprep.subr.mxu0 %v305_v0  ;;  %1010 = vmatprep.subr.mxu1 %v305_v0  ;;  %v302_v3 = vld [vmem:[%s1404_s1 + $0x20] sm:$0xff]  ;;  %v301_v4 = vld [vmem:[%s1404_s1 + $0x18] sm:$0xff]  ;;  %v300_v5 = vld [vmem:[%s1404_s1 + $0x10] sm:$0xff]  ;;  %s1106_s12 = sshll.u32 %s1411_s27, 3  ;;  %s889_s20 = sshll.u32 %s1411_s27, 2  ;;  %vm523_vm2 = vcmask 261120  }
   0xd   : > { %971 = vmatpush3.msra.mxu0 %v305_v0  ;;  %1018 = vmatpush3.msra.mxu1 %v305_v0  ;;  %v299_v6 = vld [vmem:[%s1404_s1 + $0x8] sm:$0xff]  ;;  %s1115_s17 = scalar_lea.vmem %s1403_s0, %s1106_s12  ;;  %v298_v7 = vld [vmem:[%s1404_s1] sm:$0xff]  ;;  %s1166_s29 = scalar_lea.vmem %s1407_s4, %s889_s20  ;;  %vm572_vm3 = vcmask 7168  }
   0xe   : > { %972 = vmatprep.subr.mxu0 %v304_v1  ;;  %1011 = vmatprep.subr.mxu1 %v304_v1  ;;  %v282_v8 = vld [vmem:[%s1115_s17] sm:$0xff]  ;;  %v283_v10 = vld [vmem:[%s1115_s17 + $0x8] sm:$0xff]  ;;  %v284_v12 = vld [vmem:[%s1115_s17 + $0x10] sm:$0xff]  ;;  %s1328_s7 = scalar_lea.vmem %s1408_s5, %s1106_s12  ;;  %s1338_s10 = scalar_lea.vmem %s1409_s6, %s1106_s12 }
   0xf   : > { %973 = vmatpush3.msra.mxu0 %v304_v1  ;;  %1019 = vmatpush3.msra.mxu1 %v304_v1  ;;  %v290_v9 = vld [vmem:[%s1115_s17 + $0x40] sm:$0xff]  ;;  %v291_v11 = vld [vmem:[%s1115_s17 + $0x48] sm:$0xff]  ;;  %v292_v13 = vld [vmem:[%s1115_s17 + $0x50] sm:$0xff] }
  0x10   : > { %974 = vmatprep.subr.mxu0 %v303_v2  ;;  %1012 = vmatprep.subr.mxu1 %v303_v2  ;;  %v285_v14 = vld [vmem:[%s1115_s17 + $0x18] sm:$0xff]  ;;  %v286_v16 = vld [vmem:[%s1115_s17 + $0x20] sm:$0xff]  ;;  %v287_v18 = vld [vmem:[%s1115_s17 + $0x28] sm:$0xff] }
  0x11   : > { %975 = vmatpush3.msra.mxu0 %v303_v2  ;;  %1020 = vmatpush3.msra.mxu1 %v303_v2  ;;  %v293_v15 = vld [vmem:[%s1115_s17 + $0x58] sm:$0xff]  ;;  %v294_v17 = vld [vmem:[%s1115_s17 + $0x60] sm:$0xff]  ;;  %v295_v19 = vld [vmem:[%s1115_s17 + $0x68] sm:$0xff] }
  0x12   : > { %976 = vmatprep.subr.mxu0 %v302_v3  ;;  %1013 = vmatprep.subr.mxu1 %v302_v3  ;;  %v288_v20 = vld [vmem:[%s1115_s17 + $0x30] sm:$0xff]  ;;  %v289_v22 = vld [vmem:[%s1115_s17 + $0x38] sm:$0xff]  ;;  %v1156_v24 = vld [vmem:[%s1405_s2] ss:$0 sm:$0xff] }
  0x13   : > { %977 = vmatpush3.msra.mxu0 %v302_v3  ;;  %1021 = vmatpush3.msra.mxu1 %v302_v3  ;;  %v296_v21 = vld [vmem:[%s1115_s17 + $0x70] sm:$0xff]  ;;  %v297_v23 = vld [vmem:[%s1115_s17 + $0x78] sm:$0xff]  ;;  %v1161_v25 = vld [vmem:[%s1406_s3] ss:$0 sm:$0xff] }
  0x14   : > { %978 = vmatprep.subr.mxu0 %v301_v4  ;;  %1014 = vmatprep.subr.mxu1 %v301_v4 }
  0x15   : > { %979 = vmatpush3.msra.mxu0 %v301_v4  ;;  %1022 = vmatpush3.msra.mxu1 %v301_v4 }
  0x16   : > { %980 = vmatprep.subr.mxu0 %v300_v5  ;;  %1015 = vmatprep.subr.mxu1 %v300_v5 }
  0x17   : > { %981 = vmatpush3.msra.mxu0 %v300_v5  ;;  %1023 = vmatpush3.msra.mxu1 %v300_v5 }
  0x18   : > { %982 = vmatprep.subr.mxu0 %v299_v6  ;;  %1016 = vmatprep.subr.mxu1 %v299_v6 }
  0x19   : > { %983 = vmatpush3.msra.mxu0 %v299_v6  ;;  %1024 = vmatpush3.msra.mxu1 %v299_v6 }
  0x1a   : > { %984 = vmatprep.subr.mxu0 %v298_v7  ;;  %1017 = vmatprep.subr.mxu1 %v298_v7 }
  0x1b   : > { %985 = vmatpush3.msra.mxu0 %v298_v7  ;;  %1025 = vmatpush3.msra.mxu1 %v298_v7 }
  0x1c   : > { %986 = vmatprep.mubr.msk.f32.mxu0 %vm306_vm0, %v282_v8  ;;  %998 = vmatprep.mubr.msk.f32.mxu1 %vm306_vm0, %v290_v9 }
  0x1d   : > { %987 = vmatmul.mubr.msk.f32.vlgmr.msra.gmra.mxu0 %vm306_vm0, %v283_v10  ;;  %999 = vmatmul.mubr.msk.f32.vlgmr.msra.gmra.mxu1 %vm306_vm0, %v291_v11 }
  0x1e   : > { %989 = vmatprep.mubr.msk.f32.mxu0 %vm306_vm0, %v284_v12  ;;  %1001 = vmatprep.mubr.msk.f32.mxu1 %vm306_vm0, %v292_v13 }
  0x21   : > { %990 = vmatmul.mubr.msk.f32.gmra.mxu0 %vm306_vm0, %v285_v14  ;;  %1002 = vmatmul.mubr.msk.f32.gmra.mxu1 %vm306_vm0, %v293_v15 }
  0x22   : > { %992 = vmatprep.mubr.msk.f32.mxu0 %vm306_vm0, %v286_v16  ;;  %1004 = vmatprep.mubr.msk.f32.mxu1 %vm306_vm0, %v294_v17 }
  0x25   : > { %993 = vmatmul.mubr.msk.f32.gmra.mxu0 %vm306_vm0, %v287_v18  ;;  %1005 = vmatmul.mubr.msk.f32.gmra.mxu1 %vm306_vm0, %v295_v19 }
  0x26   : > { %995 = vmatprep.mubr.msk.f32.mxu0 %vm306_vm0, %v288_v20  ;;  %1007 = vmatprep.mubr.msk.f32.mxu1 %vm306_vm0, %v296_v21 }
  0x29   : > { %996 = vmatmul.mubr.msk.f32.gmra.mxu0 %vm306_vm0, %v289_v22  ;;  %1008 = vmatmul.mubr.msk.f32.gmra.mxu1 %vm306_vm0, %v297_v23 }
  0xdd   : > { %v988_v26 = vpop.f32.mrf.mxu0  ;;  %v1000_v27 = vpop.f32.mrf.mxu1 }
  0xde   : > { %v931_v28 = vpack.c.bf16 %v988_v26, %v988_v26  ;;  %v939_v29 = vpack.c.bf16 %v1000_v27, %v1000_v27  ;;  %v516_v30 = vmul.f32 %v1000_v27, %v1156_v24  ;;  %v508_v31 = vmul.f32 %v988_v26, %v1156_v24 }
  0xdf   : > { %v421_v32 = vpop.f32.mrf.mxu0  ;;  %v461_v33 = vpop.f32.mrf.mxu1  ;;  %v597_v34 = vmul.f32 %v988_v26, %v1161_v25  ;;  %v605_v45 = vmul.f32 %v1000_v27, %v1161_v25 }
  0xe0   : > { %742 = vst.msk [vmem:[%s1166_s29 + $0x4] sm:$0xf] %vm740_vm1, %v931_v28  ;;  %750 = vst.msk [vmem:[%s1166_s29 + $0x24] sm:$0xf] %vm740_vm1, %v939_v29  ;;  %v930_v35 = vpack.c.bf16 %v421_v32, %v421_v32  ;;  %v938_v36 = vpack.c.bf16 %v461_v33, %v461_v33  ;;  %v551_v37 = vsel %vm523_vm2, %v516_v30, 0.0  ;;  %v527_v38 = vsel %vm523_vm2, %v508_v31, 0.0 }
  0xe1   : > { %552 = vadd.xlane.f32.xlu1 %v551_v37  ;;  %528 = vadd.xlane.f32.xlu0 %v527_v38  ;;  %v507_v39 = vmul.f32 %v1156_v24, %v421_v32  ;;  %v991_v40 = vpop.f32.mrf.mxu0  ;;  %v1178_v41 = vpop.f32.mrf.mxu1  ;;  %v615_v44 = vsel %vm523_vm2, %v597_v34, 0.0  ;;  %v515_v49 = vmul.f32 %v1156_v24, %v461_v33  ;;  %v639_v57 = vsel %vm523_vm2, %v605_v45, 0.0 }
  0xe2   : > { %741 = vst.msk [vmem:[%s1166_s29] sm:$0xf] %vm740_vm1, %v930_v35  ;;  %749 = vst.msk [vmem:[%s1166_s29 + $0x20] sm:$0xf] %vm740_vm1, %v938_v36  ;;  %v933_v42 = vpack.c.bf16 %v991_v40, %v991_v40  ;;  %v941_v43 = vpack.c.bf16 %v1178_v41, %v1178_v41  ;;  %v510_v54 = vmul.f32 %v991_v40, %v1156_v24 }
  0xe3   : > { %v1188_v46 = vpop.f32.mrf.mxu0  ;;  %v471_v47 = vpop.f32.mrf.mxu1  ;;  %v524_v48 = vsel %vm523_vm2, %v507_v39, 0.0  ;;  %v548_v60 = vsel %vm523_vm2, %v515_v49, 0.0  ;;  %v596_v61 = vmul.f32 %v1161_v25, %v421_v32  ;;  %v518_v3 = vmul.f32 %v1178_v41, %v1156_v24 }
  0xe4   : > { %744 = vst.msk [vmem:[%s1166_s29 + $0xc] sm:$0xf] %vm740_vm1, %v933_v42  ;;  %v932_v50 = vpack.c.bf16 %v1188_v46, %v1188_v46  ;;  %752 = vst.msk [vmem:[%s1166_s29 + $0x2c] sm:$0xf] %vm740_vm1, %v941_v43  ;;  %v940_v51 = vpack.c.bf16 %v471_v47, %v471_v47  ;;  %v533_v2 = vsel %vm523_vm2, %v510_v54, 0.0  ;;  %v604_v8 = vmul.f32 %v1161_v25, %v461_v33 }
  0xe5   : > { %616 = vadd.xlane.f32.xlu1 %v615_v44  ;;  %525 = vadd.xlane.f32.xlu0 %v524_v48  ;;  %v1198_v52 = vpop.f32.mrf.mxu0  ;;  %v1200_v53 = vpop.f32.mrf.mxu1  ;;  %v612_v7 = vsel %vm523_vm2, %v596_v61, 0.0  ;;  %v557_v11 = vsel %vm523_vm2, %v518_v3, 0.0  ;;  %v517_v14 = vmul.f32 %v1156_v24, %v471_v47  ;;  %v599_v15 = vmul.f32 %v991_v40, %v1161_v25 }
  0xe6   : > { %743 = vst.msk [vmem:[%s1166_s29 + $0x8] sm:$0xf] %vm740_vm1, %v932_v50  ;;  %751 = vst.msk [vmem:[%s1166_s29 + $0x28] sm:$0xf] %vm740_vm1, %v940_v51  ;;  %v935_v55 = vpack.c.bf16 %v1198_v52, %v1198_v52  ;;  %v943_v56 = vpack.c.bf16 %v1200_v53, %v1200_v53  ;;  %v636_v13 = vsel %vm523_vm2, %v604_v8, 0.0  ;;  %v607_v18 = vmul.f32 %v1178_v41, %v1161_v25 }
  0xe7   : > { %v1212_v58 = vpop.f32.mrf.mxu0  ;;  %v1214_v59 = vpop.f32.mrf.mxu1  ;;  %v554_v16 = vsel %vm523_vm2, %v517_v14, 0.0  ;;  %v621_v17 = vsel %vm523_vm2, %v599_v15, 0.0  ;;  %v598_v19 = vmul.f32 %v1161_v25, %v1188_v46  ;;  %v606_v22 = vmul.f32 %v1161_v25, %v471_v47 }
  0xe8   : > { %746 = vst.msk [vmem:[%s1166_s29 + $0x14] sm:$0xf] %vm740_vm1, %v935_v55  ;;  %v934_v62 = vpack.c.bf16 %v1212_v58, %v1212_v58  ;;  %754 = vst.msk [vmem:[%s1166_s29 + $0x34] sm:$0xf] %vm740_vm1, %v943_v56  ;;  %v942_v63 = vpack.c.bf16 %v1214_v59, %v1214_v59  ;;  %v645_v20 = vsel %vm523_vm2, %v607_v18, 0.0  ;;  %v509_v23 = vmul.f32 %v1156_v24, %v1188_v46 }
  0xe9   : > { %640 = vadd.xlane.f32.xlu1 %v639_v57  ;;  %549 = vadd.xlane.f32.xlu0 %v548_v60  ;;  %v1226_v0 = vpop.f32.mrf.mxu0  ;;  %v1228_v1 = vpop.f32.mrf.mxu1  ;;  %v618_v21 = vsel %vm523_vm2, %v598_v19, 0.0  ;;  %v642_v26 = vsel %vm523_vm2, %v606_v22, 0.0  ;;  %v512_v28 = vmul.f32 %v1198_v52, %v1156_v24  ;;  %v511_v29 = vmul.f32 %v1156_v24, %v1212_v58 }
  0xea   : > { %745 = vst.msk [vmem:[%s1166_s29 + $0x10] sm:$0xf] %vm740_vm1, %v934_v62  ;;  %753 = vst.msk [vmem:[%s1166_s29 + $0x30] sm:$0xf] %vm740_vm1, %v942_v63  ;;  %v937_v4 = vpack.c.bf16 %v1226_v0, %v1226_v0  ;;  %v945_v6 = vpack.c.bf16 %v1228_v1, %v1228_v1  ;;  %v530_v27 = vsel %vm523_vm2, %v509_v23, 0.0  ;;  %v520_v32 = vmul.f32 %v1200_v53, %v1156_v24 }
  0xeb   : > { %v1239_v5 = vpop.f32.mrf.mxu0  ;;  %v1245_v9 = vpop.f32.mrf.mxu1  ;;  %v539_v30 = vsel %vm523_vm2, %v512_v28, 0.0  ;;  %v536_v31 = vsel %vm523_vm2, %v511_v29, 0.0  ;;  %v519_v33 = vmul.f32 %v1156_v24, %v1214_v59  ;;  %v601_v36 = vmul.f32 %v1198_v52, %v1161_v25 }
  0xec   : > { %748 = vst.msk [vmem:[%s1166_s29 + $0x1c] sm:$0xf] %vm740_vm1, %v937_v4  ;;  %v936_v10 = vpack.c.bf16 %v1239_v5, %v1239_v5  ;;  %756 = vst.msk [vmem:[%s1166_s29 + $0x3c] sm:$0xf] %vm740_vm1, %v945_v6  ;;  %v944_v12 = vpack.c.bf16 %v1245_v9, %v1245_v9  ;;  %v563_v34 = vsel %vm523_vm2, %v520_v32, 0.0  ;;  %v600_v37 = vmul.f32 %v1161_v25, %v1212_v58 }
  0xed   : > { %613 = vadd.xlane.f32.xlu0 %v612_v7  ;;  %534 = vadd.xlane.f32.xlu1 %v533_v2  ;;  %v560_v35 = vsel %vm523_vm2, %v519_v33, 0.0  ;;  %v627_v38 = vsel %vm523_vm2, %v601_v36, 0.0  ;;  %v609_v40 = vmul.f32 %v1200_v53, %v1161_v25  ;;  %v608_v41 = vmul.f32 %v1161_v25, %v1214_v59 }
  0xee   : > { %747 = vst.msk [vmem:[%s1166_s29 + $0x18] sm:$0xf] %vm740_vm1, %v936_v10  ;;  %755 = vst.msk [vmem:[%s1166_s29 + $0x38] sm:$0xf] %vm740_vm1, %v944_v12  ;;  %v624_v39 = vsel %vm523_vm2, %v600_v37, 0.0  ;;  %v513_v42 = vmul.f32 %v1156_v24, %v1239_v5  ;;  %v514_v45 = vmul.f32 %v1226_v0, %v1156_v24  ;;  %v521_v46 = vmul.f32 %v1156_v24, %v1245_v9 }
  0xef   : > { %v651_v43 = vsel %vm523_vm2, %v609_v40, 0.0  ;;  %v648_v44 = vsel %vm523_vm2, %v608_v41, 0.0  ;;  %v522_v49 = vmul.f32 %v1228_v1, %v1156_v24  ;;  %v602_v50 = vmul.f32 %v1161_v25, %v1239_v5 }
  0xf0   : > { %v545_v47 = vsel %vm523_vm2, %v514_v45, 0.0  ;;  %v542_v48 = vsel %vm523_vm2, %v513_v42, 0.0  ;;  %v566_v52 = vsel %vm523_vm2, %v521_v46, 0.0  ;;  %v603_v53 = vmul.f32 %v1226_v0, %v1161_v25 }
  0xf1   : > { %637 = vadd.xlane.f32.xlu0 %v636_v13  ;;  %558 = vadd.xlane.f32.xlu1 %v557_v11  ;;  %v569_v51 = vsel %vm523_vm2, %v522_v49, 0.0  ;;  %v610_v54 = vmul.f32 %v1161_v25, %v1245_v9  ;;  %v630_v55 = vsel %vm523_vm2, %v602_v50, 0.0  ;;  %v611_v56 = vmul.f32 %v1228_v1, %v1161_v25 }
  0xf2   : > { %v633_v24 = vsel %vm523_vm2, %v603_v53, 0.0 }
  0xf3   : > { %v657_v57 = vsel %vm523_vm2, %v611_v56, 0.0  ;;  %v654_v58 = vsel %vm523_vm2, %v610_v54, 0.0 }
  0xf5   : > { %555 = vadd.xlane.f32.xlu0 %v554_v16  ;;  %622 = vadd.xlane.f32.xlu1 %v621_v17 }
  0xf9   : > { %646 = vadd.xlane.f32.xlu1 %v645_v20  ;;  %619 = vadd.xlane.f32.xlu0 %v618_v21 }
  0xfd   : > { %643 = vadd.xlane.f32.xlu0 %v642_v26  ;;  %531 = vadd.xlane.f32.xlu1 %v530_v27 }
 0x101   : > { %540 = vadd.xlane.f32.xlu1 %v539_v30  ;;  %537 = vadd.xlane.f32.xlu0 %v536_v31 }
 0x105   : > { %564 = vadd.xlane.f32.xlu1 %v563_v34  ;;  %561 = vadd.xlane.f32.xlu0 %v560_v35 }
 0x109   : > { %628 = vadd.xlane.f32.xlu1 %v627_v38  ;;  %625 = vadd.xlane.f32.xlu0 %v624_v39 }
 0x10d   : > { %652 = vadd.xlane.f32.xlu1 %v651_v43  ;;  %649 = vadd.xlane.f32.xlu0 %v648_v44 }
 0x111   : > { %546 = vadd.xlane.f32.xlu1 %v545_v47  ;;  %543 = vadd.xlane.f32.xlu0 %v542_v48 }
 0x115   : > { %570 = vadd.xlane.f32.xlu1 %v569_v51  ;;  %567 = vadd.xlane.f32.xlu0 %v566_v52 }
 0x119   : > { %634 = vadd.xlane.f32.xlu1 %v633_v24  ;;  %631 = vadd.xlane.f32.xlu0 %v630_v55 }
 0x11d   : > { %658 = vadd.xlane.f32.xlu1 %v657_v57  ;;  %655 = vadd.xlane.f32.xlu0 %v654_v58 }
 0x16a   : > { %v553_v59 = vpop.xlane.xlu1 %552  ;;  %v529_v25 = vpop.xlane.xlu0 %528 }
 0x16b   : > { %582 = vst.msk [vmem:[%s1328_s7 + $0x48] sm:$0xff] %vm572_vm3, %v553_v59  ;;  %574 = vst.msk [vmem:[%s1328_s7 + $0x8] sm:$0xff] %vm572_vm3, %v529_v25 }
 0x16e   : > { %v617_v60 = vpop.xlane.xlu1 %616  ;;  %v526_v61 = vpop.xlane.xlu0 %525 }
 0x16f   : > { %661 = vst.msk [vmem:[%s1338_s10 + $0x8] sm:$0xff] %vm572_vm3, %v617_v60  ;;  %573 = vst.msk [vmem:[%s1328_s7] sm:$0xff] %vm572_vm3, %v526_v61 }
 0x172   : > { %v641_v62 = vpop.xlane.xlu1 %640  ;;  %v550_v63 = vpop.xlane.xlu0 %549 }
 0x173   : > { %669 = vst.msk [vmem:[%s1338_s10 + $0x48] sm:$0xff] %vm572_vm3, %v641_v62  ;;  %581 = vst.msk [vmem:[%s1328_s7 + $0x40] sm:$0xff] %vm572_vm3, %v550_v63 }
 0x176   : > { %v614_v0 = vpop.xlane.xlu0 %613  ;;  %v535_v1 = vpop.xlane.xlu1 %534 }
 0x177   : > { %660 = vst.msk [vmem:[%s1338_s10] sm:$0xff] %vm572_vm3, %v614_v0  ;;  %576 = vst.msk [vmem:[%s1328_s7 + $0x18] sm:$0xff] %vm572_vm3, %v535_v1 }
 0x17a   : > { %v638_v2 = vpop.xlane.xlu0 %637  ;;  %v559_v3 = vpop.xlane.xlu1 %558 }
 0x17b   : > { %668 = vst.msk [vmem:[%s1338_s10 + $0x40] sm:$0xff] %vm572_vm3, %v638_v2  ;;  %584 = vst.msk [vmem:[%s1328_s7 + $0x58] sm:$0xff] %vm572_vm3, %v559_v3 }
 0x17e   : > { %v556_v4 = vpop.xlane.xlu0 %555  ;;  %v623_v5 = vpop.xlane.xlu1 %622 }
 0x17f   : > { %583 = vst.msk [vmem:[%s1328_s7 + $0x50] sm:$0xff] %vm572_vm3, %v556_v4  ;;  %663 = vst.msk [vmem:[%s1338_s10 + $0x18] sm:$0xff] %vm572_vm3, %v623_v5 }
 0x182   : > { %v647_v6 = vpop.xlane.xlu1 %646  ;;  %v620_v7 = vpop.xlane.xlu0 %619 }
 0x183   : > { %671 = vst.msk [vmem:[%s1338_s10 + $0x58] sm:$0xff] %vm572_vm3, %v647_v6  ;;  %662 = vst.msk [vmem:[%s1338_s10 + $0x10] sm:$0xff] %vm572_vm3, %v620_v7 }
 0x186   : > { %v644_v8 = vpop.xlane.xlu0 %643  ;;  %v532_v9 = vpop.xlane.xlu1 %531 }
 0x187   : > { %670 = vst.msk [vmem:[%s1338_s10 + $0x50] sm:$0xff] %vm572_vm3, %v644_v8  ;;  %575 = vst.msk [vmem:[%s1328_s7 + $0x10] sm:$0xff] %vm572_vm3, %v532_v9 }
 0x18a   : > { %v541_v10 = vpop.xlane.xlu1 %540  ;;  %v538_v11 = vpop.xlane.xlu0 %537 }
 0x18b   : > { %578 = vst.msk [vmem:[%s1328_s7 + $0x28] sm:$0xff] %vm572_vm3, %v541_v10  ;;  %577 = vst.msk [vmem:[%s1328_s7 + $0x20] sm:$0xff] %vm572_vm3, %v538_v11 }
 0x18e   : > { %v565_v12 = vpop.xlane.xlu1 %564  ;;  %v562_v13 = vpop.xlane.xlu0 %561 }
 0x18f   : > { %586 = vst.msk [vmem:[%s1328_s7 + $0x68] sm:$0xff] %vm572_vm3, %v565_v12  ;;  %585 = vst.msk [vmem:[%s1328_s7 + $0x60] sm:$0xff] %vm572_vm3, %v562_v13 }
 0x192   : > { %v629_v14 = vpop.xlane.xlu1 %628  ;;  %v626_v15 = vpop.xlane.xlu0 %625 }
 0x193   : > { %665 = vst.msk [vmem:[%s1338_s10 + $0x28] sm:$0xff] %vm572_vm3, %v629_v14  ;;  %664 = vst.msk [vmem:[%s1338_s10 + $0x20] sm:$0xff] %vm572_vm3, %v626_v15 }
 0x196   : > { %v653_v16 = vpop.xlane.xlu1 %652  ;;  %v650_v17 = vpop.xlane.xlu0 %649 }
 0x197   : > { %673 = vst.msk [vmem:[%s1338_s10 + $0x68] sm:$0xff] %vm572_vm3, %v653_v16  ;;  %672 = vst.msk [vmem:[%s1338_s10 + $0x60] sm:$0xff] %vm572_vm3, %v650_v17 }
 0x19a   : > { %v547_v18 = vpop.xlane.xlu1 %546  ;;  %v544_v19 = vpop.xlane.xlu0 %543 }
 0x19b   : > { %580 = vst.msk [vmem:[%s1328_s7 + $0x38] sm:$0xff] %vm572_vm3, %v547_v18  ;;  %579 = vst.msk [vmem:[%s1328_s7 + $0x30] sm:$0xff] %vm572_vm3, %v544_v19 }
 0x19e   : > { %v571_v20 = vpop.xlane.xlu1 %570  ;;  %v568_v21 = vpop.xlane.xlu0 %567 }
 0x19f   : > { %588 = vst.msk [vmem:[%s1328_s7 + $0x78] sm:$0xff] %vm572_vm3, %v571_v20  ;;  %587 = vst.msk [vmem:[%s1328_s7 + $0x70] sm:$0xff] %vm572_vm3, %v568_v21 }
 0x1a2   : > { %v635_v22 = vpop.xlane.xlu1 %634  ;;  %v632_v23 = vpop.xlane.xlu0 %631 }
 0x1a3   : > { %667 = vst.msk [vmem:[%s1338_s10 + $0x38] sm:$0xff] %vm572_vm3, %v635_v22  ;;  %666 = vst.msk [vmem:[%s1338_s10 + $0x30] sm:$0xff] %vm572_vm3, %v632_v23 }
 0x1a6   : > { %v659_v26 = vpop.xlane.xlu1 %658  ;;  %v656_v27 = vpop.xlane.xlu0 %655 }
 0x1a7   : > { %675 = vst.msk [vmem:[%s1338_s10 + $0x78] sm:$0xff] %vm572_vm3, %v659_v26  ;;  %674 = vst.msk [vmem:[%s1338_s10 + $0x70] sm:$0xff] %vm572_vm3, %v656_v27 }
 0x1a8 PF: > { %s17_s21 = sadd.s32 1, %s1040_s21  }
 0x1a9   : > { %p14_p4 = scmp.ge.s32.totalorder %s17_s21, 4  }
 0x1ab   :  { %16 = sbr.rel (!%p14_p4) target bundleno = 1 (0x1), region = 90 }

</bundles_post_ra>
